<compile_context>
chip_gen: v7x
topology: tpu7x:2x2x1
jax: 0.10.0
libtpu: 0.0.40
codegen_flags: <defaults>
</compile_context>

<pallas_src>
from functools import partial

import numpy as np
import jax
import jax.numpy as jnp
from jax.experimental import pallas as pl
from jax.experimental.pallas import tpu as pltpu

_INV_SQRT2 = 0.7071067811865476      # 1/sqrt(2)
_INV_SQRT_2PI = 0.3989422804014327   # 1/sqrt(2*pi)


def _gelu_triple(z, zd, zdd=None):
    """Exact-erf GELU value + 1st/2nd time-derivative via chain rule."""
    phi = jnp.exp(-0.5 * z * z) * _INV_SQRT_2PI       # N(0,1) pdf
    Phi = 0.5 * (1.0 + jax.lax.erf(z * _INV_SQRT2))   # N(0,1) cdf
    zphi = z * phi
    g1 = Phi + zphi                                   # gelu'(z)
    g2 = 2.0 * phi - z * zphi                         # gelu''(z) = (2 - z^2) phi
    u = z * Phi
    du = g1 * zd
    ddu = g2 * (zd * zd)
    if zdd is not None:
        ddu = ddu + g1 * zdd
    return u, du, ddu


def _make_kernel(num_layers, Bp):
    """refs = [x_pad (Bp,P), W_packed (L,P,P), b_packed (L,1,P), out (3Bp,P)]."""

    def kernel(x_ref, w_ref, b_ref, out_ref):
        # ---- layer 0 (special case: du is one-hot on the time column) ----
        w0 = w_ref[0]                                   # (P, P)
        z = jnp.dot(x_ref[...], w0,
                    preferred_element_type=jnp.float32) + b_ref[0]
        zd = jnp.broadcast_to(w0[0:1, :], z.shape)      # d z0 / dt = W0[0, :]
        if num_layers == 1:
            u, du, ddu = z, zd, jnp.zeros_like(z)
        else:
            u, du, ddu = _gelu_triple(z, zd)            # zdd0 == 0

        # ---- layers 1..L-1: one fused (3Bp, P) x (P, P) matmul per layer ----
        # LHS is built with concatenate (stays in vregs) -- no out_ref staging,
        # no store->load dependency on the critical path.
        for li in range(1, num_layers):                 # static depth -> unrolled
            lhs = jnp.concatenate([u, du, ddu], axis=0)  # (3Bp, P)
            zs = jnp.dot(lhs, w_ref[li],
                         preferred_element_type=jnp.float32)   # (3Bp, P)
            z = zs[0:Bp] + b_ref[li]
            zd = zs[Bp:2 * Bp]
            zdd = zs[2 * Bp:3 * Bp]
            if li < num_layers - 1:
                u, du, ddu = _gelu_triple(z, zd, zdd)
            else:
                u, du, ddu = z, zd, zdd

        # ---- single lane-dense output slab [y; yDot; yDDot] ----
        out_ref[0:Bp, :] = u
        out_ref[Bp:2 * Bp, :] = du
        out_ref[2 * Bp:3 * Bp, :] = ddu

    return kernel


def _round_up(n, m):
    return -(-n // m) * m


def pack_net_ag_params(weights, biases):
    """One-time (host-side) packing of all layers into padded operands.

    Returns (w_packed (L,P,P) f32, b_packed (L,1,P) f32, P)."""
    num_layers = len(weights)
    dims = [w.shape[0] for w in weights] + [w.shape[1] for w in weights]
    P = _round_up(max(dims), 128)        # lane-dense feature padding
    w_packed = np.zeros((num_layers, P, P), np.float32)
    b_packed = np.zeros((num_layers, 1, P), np.float32)
    for li, (w, b) in enumerate(zip(weights, biases)):
        w_np = np.asarray(w, dtype=np.float32)
        b_np = np.asarray(b, dtype=np.float32)
        w_packed[li, :w_np.shape[0], :w_np.shape[1]] = w_np
        b_packed[li, 0, :b_np.shape[0]] = b_np
    return jnp.asarray(w_packed), jnp.asarray(b_packed), P


@partial(jax.jit, static_argnames=("out_dim",))
def net_ag_forward_packed(x, w_packed, b_packed, *, out_dim):
    """Returns (y, yDot, yDDot), each (B, out_dim) float32."""
    num_layers, P, _ = w_packed.shape
    B, input_dim = x.shape
    Bp = _round_up(B, 8)                 # sublane-aligned batch padding

    # Zero padding is exact: padded rows/cols stay identically 0 through every
    # layer (weights/biases are zero-padded too).
    x_pad = jnp.zeros((Bp, P), jnp.float32).at[:B, :input_dim].set(
        x.astype(jnp.float32))

    flops = 2 * Bp * P * P + 2 * (num_layers - 1) * (3 * Bp) * P * P
    transcendentals = 2 * max(num_layers - 1, 0) * Bp * P     # exp + erf / gelu
    bytes_accessed = 4 * (x_pad.size + w_packed.size + b_packed.size + 3 * Bp * P)

    # Tiny problem -> no grid; every operand is a full-array VMEM block.
    # TODO(synk): if batch grows to PINN-scale (>=1k rows), add a parallel
    # batch grid (shards across v7x's 2 TensorCores) with weights kept resident.
    out = pl.pallas_call(
        _make_kernel(num_layers, Bp),
        out_shape=jax.ShapeDtypeStruct((3 * Bp, P), jnp.float32),
        in_specs=[pl.BlockSpec(memory_space=pltpu.MemorySpace.VMEM)] * 3,
        out_specs=pl.BlockSpec(memory_space=pltpu.MemorySpace.VMEM),
        cost_estimate=pl.CostEstimate(
            flops=flops,
            transcendentals=transcendentals,
            bytes_accessed=bytes_accessed),
    )(x_pad, w_packed, b_packed)

    y = out[0:B, :out_dim]
    yd = out[Bp:Bp + B, :out_dim]
    ydd = out[2 * Bp:2 * Bp + B, :out_dim]
    return y, yd, ydd


def net_ag_forward(x, weights, biases):
    """Convenience wrapper: packs per call (prefer packing once at init)."""
    w_packed, b_packed, _ = pack_net_ag_params(weights, biases)
    return net_ag_forward_packed(x, w_packed, b_packed,
                                 out_dim=int(weights[-1].shape[1]))


if __name__ == "__main__":
    # Small shapes implied by the module. output_dim=1 is the configuration the
    # PyTorch grad loop actually supports (grad_outputs shape must match y).
    input_dim, width, depth, output_dim = 4, 32, 3, 1
    B = 8

    key = jax.random.PRNGKey(0)
    dims = [input_dim] + [width] * depth + [output_dim]
    weights, biases = [], []
    for i in range(depth + 1):
        key, kw, kb = jax.random.split(key, 3)
        weights.append((jax.random.normal(kw, (dims[i], dims[i + 1]), jnp.float32)
                        / jnp.sqrt(dims[i])).astype(jnp.float32))
        biases.append(0.1 * jax.random.normal(kb, (dims[i + 1],), jnp.float32))
    key, kx = jax.random.split(key)
    x = jax.random.normal(kx, (B, input_dim), jnp.float32)

    # Pack once (model-init time), then call the jitted forward.
    w_packed, b_packed, _ = pack_net_ag_params(weights, biases)
    y, ydot, yddot = jax.block_until_ready(
        net_ag_forward_packed(x, w_packed, b_packed, out_dim=output_dim))

    # Reference: pure-JAX MLP with nested JVPs w.r.t. the time column
    # (semantics of the torch.autograd.grad loop).
    def ref_mlp(inp):
        u = inp
        for i, (w, b) in enumerate(zip(weights, biases)):
            u = u @ w + b
            if i < len(weights) - 1:
                u = 0.5 * u * (1.0 + jax.lax.erf(u * _INV_SQRT2))
        return u

    def f_of_t(t):
        return ref_mlp(jnp.concatenate([t[:, None], x[:, 1:]], axis=1))

    t0 = x[:, 0]
    ones = jnp.ones_like(t0)
    y_ref, yd_ref = jax.jvp(f_of_t, (t0,), (ones,))
    _, ydd_ref = jax.jvp(lambda t: jax.jvp(f_of_t, (t,), (jnp.ones_like(t),))[1],
                         (t0,), (ones,))

    assert jnp.allclose(y, y_ref, atol=1e-4, rtol=1e-4)
    assert jnp.allclose(ydot, yd_ref, atol=1e-4, rtol=1e-4)
    assert jnp.allclose(yddot, ydd_ref, atol=1e-3, rtol=1e-3)
    print("KERNEL_OK")
</pallas_src>

<mosaic_0001>
module attributes {stable_mosaic.version = 11 : i64} {
  func.func @kernel(%arg0: memref<8x128xf32, #tpu.memory_space<vmem>>, %arg1: memref<4x128x128xf32, #tpu.memory_space<vmem>>, %arg2: memref<4x1x128xf32, #tpu.memory_space<vmem>>, %arg3: memref<24x128xf32, #tpu.memory_space<vmem>>) attributes {dimension_semantics = [], scalar_prefetch = 0 : i64, scratch_operands = 0 : i64, tpu.core_type = #tpu.core_type<tc>} {
    %c0 = arith.constant 0 : index
    %c0_0 = arith.constant 0 : index
    %c0_1 = arith.constant 0 : index
    %0 = vector.load %arg1[%c0, %c0_0, %c0_1] : memref<4x128x128xf32, #tpu.memory_space<vmem>>, vector<1x128x128xf32>
    %1 = vector.shape_cast %0 : vector<1x128x128xf32> to vector<128x128xf32>
    %c0_2 = arith.constant 0 : index
    %c0_3 = arith.constant 0 : index
    %2 = vector.load %arg0[%c0_2, %c0_3] : memref<8x128xf32, #tpu.memory_space<vmem>>, vector<8x128xf32>
    %cst = arith.constant dense<0.000000e+00> : vector<8x128xf32>
    %3 = tpu.matmul %2, %1, %cst {dimension_numbers = #tpu.dot_dimension_numbers<[1], [0], [0], [1], [0, 0, 1, 1], [], []>} : vector<8x128xf32>, vector<128x128xf32>, vector<8x128xf32> -> vector<8x128xf32>
    %c0_4 = arith.constant 0 : index
    %c0_5 = arith.constant 0 : index
    %c0_6 = arith.constant 0 : index
    %4 = vector.load %arg2[%c0_4, %c0_5, %c0_6] : memref<4x1x128xf32, #tpu.memory_space<vmem>>, vector<1x1x128xf32>
    %5 = vector.shape_cast %4 : vector<1x1x128xf32> to vector<1x128xf32>
    %6 = vector.broadcast %5 : vector<1x128xf32> to vector<8x128xf32>
    %7 = arith.addf %3, %6 : vector<8x128xf32>
    %8 = vector.extract_strided_slice %1 {offsets = [0, 0], sizes = [1, 128], strides = [1, 1]} : vector<128x128xf32> to vector<1x128xf32>
    %9 = vector.shape_cast %8 : vector<1x128xf32> to vector<1x128xf32>
    %10 = vector.broadcast %9 : vector<1x128xf32> to vector<8x128xf32>
    %cst_7 = arith.constant -5.000000e-01 : f32
    %11 = vector.broadcast %cst_7 : f32 to vector<8x128xf32>
    %12 = arith.mulf %11, %7 : vector<8x128xf32>
    %13 = arith.mulf %12, %7 : vector<8x128xf32>
    %14 = math.exp %13 : vector<8x128xf32>
    %cst_8 = arith.constant 0.398942292 : f32
    %15 = vector.broadcast %cst_8 : f32 to vector<8x128xf32>
    %16 = arith.mulf %14, %15 : vector<8x128xf32>
    %cst_9 = arith.constant 0.707106769 : f32
    %17 = vector.broadcast %cst_9 : f32 to vector<8x128xf32>
    %18 = arith.mulf %7, %17 : vector<8x128xf32>
    %19 = math.erf %18 : vector<8x128xf32>
    %cst_10 = arith.constant 1.000000e+00 : f32
    %20 = vector.broadcast %cst_10 : f32 to vector<8x128xf32>
    %21 = arith.addf %20, %19 : vector<8x128xf32>
    %cst_11 = arith.constant 5.000000e-01 : f32
    %22 = vector.broadcast %cst_11 : f32 to vector<8x128xf32>
    %23 = arith.mulf %22, %21 : vector<8x128xf32>
    %24 = arith.mulf %7, %16 : vector<8x128xf32>
    %25 = arith.addf %23, %24 : vector<8x128xf32>
    %cst_12 = arith.constant 2.000000e+00 : f32
    %26 = vector.broadcast %cst_12 : f32 to vector<8x128xf32>
    %27 = arith.mulf %26, %16 : vector<8x128xf32>
    %28 = arith.mulf %7, %24 : vector<8x128xf32>
    %29 = arith.subf %27, %28 : vector<8x128xf32>
    %30 = arith.mulf %7, %23 : vector<8x128xf32>
    %31 = arith.mulf %25, %10 : vector<8x128xf32>
    %32 = arith.mulf %10, %10 : vector<8x128xf32>
    %33 = arith.mulf %29, %32 : vector<8x128xf32>
    %34 = tpu.concatenate %30, %31, %33 in 0 : vector<8x128xf32>, vector<8x128xf32>, vector<8x128xf32> -> vector<24x128xf32>
    %c1 = arith.constant 1 : index
    %c0_13 = arith.constant 0 : index
    %c0_14 = arith.constant 0 : index
    %35 = vector.load %arg1[%c1, %c0_13, %c0_14] : memref<4x128x128xf32, #tpu.memory_space<vmem>>, vector<1x128x128xf32>
    %36 = vector.shape_cast %35 : vector<1x128x128xf32> to vector<128x128xf32>
    %cst_15 = arith.constant dense<0.000000e+00> : vector<24x128xf32>
    %37 = tpu.matmul %34, %36, %cst_15 {dimension_numbers = #tpu.dot_dimension_numbers<[1], [0], [0], [1], [0, 0, 1, 1], [], []>} : vector<24x128xf32>, vector<128x128xf32>, vector<24x128xf32> -> vector<24x128xf32>
    %38 = vector.extract_strided_slice %37 {offsets = [0, 0], sizes = [8, 128], strides = [1, 1]} : vector<24x128xf32> to vector<8x128xf32>
    %c1_16 = arith.constant 1 : index
    %c0_17 = arith.constant 0 : index
    %c0_18 = arith.constant 0 : index
    %39 = vector.load %arg2[%c1_16, %c0_17, %c0_18] : memref<4x1x128xf32, #tpu.memory_space<vmem>>, vector<1x1x128xf32>
    %40 = vector.shape_cast %39 : vector<1x1x128xf32> to vector<1x128xf32>
    %41 = vector.broadcast %40 : vector<1x128xf32> to vector<8x128xf32>
    %42 = arith.addf %38, %41 : vector<8x128xf32>
    %43 = vector.extract_strided_slice %37 {offsets = [8, 0], sizes = [8, 128], strides = [1, 1]} : vector<24x128xf32> to vector<8x128xf32>
    %44 = vector.extract_strided_slice %37 {offsets = [16, 0], sizes = [8, 128], strides = [1, 1]} : vector<24x128xf32> to vector<8x128xf32>
    %cst_19 = arith.constant -5.000000e-01 : f32
    %45 = vector.broadcast %cst_19 : f32 to vector<8x128xf32>
    %46 = arith.mulf %45, %42 : vector<8x128xf32>
    %47 = arith.mulf %46, %42 : vector<8x128xf32>
    %48 = math.exp %47 : vector<8x128xf32>
    %cst_20 = arith.constant 0.398942292 : f32
    %49 = vector.broadcast %cst_20 : f32 to vector<8x128xf32>
    %50 = arith.mulf %48, %49 : vector<8x128xf32>
    %cst_21 = arith.constant 0.707106769 : f32
    %51 = vector.broadcast %cst_21 : f32 to vector<8x128xf32>
    %52 = arith.mulf %42, %51 : vector<8x128xf32>
    %53 = math.erf %52 : vector<8x128xf32>
    %cst_22 = arith.constant 1.000000e+00 : f32
    %54 = vector.broadcast %cst_22 : f32 to vector<8x128xf32>
    %55 = arith.addf %54, %53 : vector<8x128xf32>
    %cst_23 = arith.constant 5.000000e-01 : f32
    %56 = vector.broadcast %cst_23 : f32 to vector<8x128xf32>
    %57 = arith.mulf %56, %55 : vector<8x128xf32>
    %58 = arith.mulf %42, %50 : vector<8x128xf32>
    %59 = arith.addf %57, %58 : vector<8x128xf32>
    %cst_24 = arith.constant 2.000000e+00 : f32
    %60 = vector.broadcast %cst_24 : f32 to vector<8x128xf32>
    %61 = arith.mulf %60, %50 : vector<8x128xf32>
    %62 = arith.mulf %42, %58 : vector<8x128xf32>
    %63 = arith.subf %61, %62 : vector<8x128xf32>
    %64 = arith.mulf %42, %57 : vector<8x128xf32>
    %65 = arith.mulf %59, %43 : vector<8x128xf32>
    %66 = arith.mulf %43, %43 : vector<8x128xf32>
    %67 = arith.mulf %63, %66 : vector<8x128xf32>
    %68 = arith.mulf %59, %44 : vector<8x128xf32>
    %69 = arith.addf %67, %68 : vector<8x128xf32>
    %70 = tpu.concatenate %64, %65, %69 in 0 : vector<8x128xf32>, vector<8x128xf32>, vector<8x128xf32> -> vector<24x128xf32>
    %c2 = arith.constant 2 : index
    %c0_25 = arith.constant 0 : index
    %c0_26 = arith.constant 0 : index
    %71 = vector.load %arg1[%c2, %c0_25, %c0_26] : memref<4x128x128xf32, #tpu.memory_space<vmem>>, vector<1x128x128xf32>
    %72 = vector.shape_cast %71 : vector<1x128x128xf32> to vector<128x128xf32>
    %cst_27 = arith.constant dense<0.000000e+00> : vector<24x128xf32>
    %73 = tpu.matmul %70, %72, %cst_27 {dimension_numbers = #tpu.dot_dimension_numbers<[1], [0], [0], [1], [0, 0, 1, 1], [], []>} : vector<24x128xf32>, vector<128x128xf32>, vector<24x128xf32> -> vector<24x128xf32>
    %74 = vector.extract_strided_slice %73 {offsets = [0, 0], sizes = [8, 128], strides = [1, 1]} : vector<24x128xf32> to vector<8x128xf32>
    %c2_28 = arith.constant 2 : index
    %c0_29 = arith.constant 0 : index
    %c0_30 = arith.constant 0 : index
    %75 = vector.load %arg2[%c2_28, %c0_29, %c0_30] : memref<4x1x128xf32, #tpu.memory_space<vmem>>, vector<1x1x128xf32>
    %76 = vector.shape_cast %75 : vector<1x1x128xf32> to vector<1x128xf32>
    %77 = vector.broadcast %76 : vector<1x128xf32> to vector<8x128xf32>
    %78 = arith.addf %74, %77 : vector<8x128xf32>
    %79 = vector.extract_strided_slice %73 {offsets = [8, 0], sizes = [8, 128], strides = [1, 1]} : vector<24x128xf32> to vector<8x128xf32>
    %80 = vector.extract_strided_slice %73 {offsets = [16, 0], sizes = [8, 128], strides = [1, 1]} : vector<24x128xf32> to vector<8x128xf32>
    %cst_31 = arith.constant -5.000000e-01 : f32
    %81 = vector.broadcast %cst_31 : f32 to vector<8x128xf32>
    %82 = arith.mulf %81, %78 : vector<8x128xf32>
    %83 = arith.mulf %82, %78 : vector<8x128xf32>
    %84 = math.exp %83 : vector<8x128xf32>
    %cst_32 = arith.constant 0.398942292 : f32
    %85 = vector.broadcast %cst_32 : f32 to vector<8x128xf32>
    %86 = arith.mulf %84, %85 : vector<8x128xf32>
    %cst_33 = arith.constant 0.707106769 : f32
    %87 = vector.broadcast %cst_33 : f32 to vector<8x128xf32>
    %88 = arith.mulf %78, %87 : vector<8x128xf32>
    %89 = math.erf %88 : vector<8x128xf32>
    %cst_34 = arith.constant 1.000000e+00 : f32
    %90 = vector.broadcast %cst_34 : f32 to vector<8x128xf32>
    %91 = arith.addf %90, %89 : vector<8x128xf32>
    %cst_35 = arith.constant 5.000000e-01 : f32
    %92 = vector.broadcast %cst_35 : f32 to vector<8x128xf32>
    %93 = arith.mulf %92, %91 : vector<8x128xf32>
    %94 = arith.mulf %78, %86 : vector<8x128xf32>
    %95 = arith.addf %93, %94 : vector<8x128xf32>
    %cst_36 = arith.constant 2.000000e+00 : f32
    %96 = vector.broadcast %cst_36 : f32 to vector<8x128xf32>
    %97 = arith.mulf %96, %86 : vector<8x128xf32>
    %98 = arith.mulf %78, %94 : vector<8x128xf32>
    %99 = arith.subf %97, %98 : vector<8x128xf32>
    %100 = arith.mulf %78, %93 : vector<8x128xf32>
    %101 = arith.mulf %95, %79 : vector<8x128xf32>
    %102 = arith.mulf %79, %79 : vector<8x128xf32>
    %103 = arith.mulf %99, %102 : vector<8x128xf32>
    %104 = arith.mulf %95, %80 : vector<8x128xf32>
    %105 = arith.addf %103, %104 : vector<8x128xf32>
    %106 = tpu.concatenate %100, %101, %105 in 0 : vector<8x128xf32>, vector<8x128xf32>, vector<8x128xf32> -> vector<24x128xf32>
    %c3 = arith.constant 3 : index
    %c0_37 = arith.constant 0 : index
    %c0_38 = arith.constant 0 : index
    %107 = vector.load %arg1[%c3, %c0_37, %c0_38] : memref<4x128x128xf32, #tpu.memory_space<vmem>>, vector<1x128x128xf32>
    %108 = vector.shape_cast %107 : vector<1x128x128xf32> to vector<128x128xf32>
    %cst_39 = arith.constant dense<0.000000e+00> : vector<24x128xf32>
    %109 = tpu.matmul %106, %108, %cst_39 {dimension_numbers = #tpu.dot_dimension_numbers<[1], [0], [0], [1], [0, 0, 1, 1], [], []>} : vector<24x128xf32>, vector<128x128xf32>, vector<24x128xf32> -> vector<24x128xf32>
    %110 = vector.extract_strided_slice %109 {offsets = [0, 0], sizes = [8, 128], strides = [1, 1]} : vector<24x128xf32> to vector<8x128xf32>
    %c3_40 = arith.constant 3 : index
    %c0_41 = arith.constant 0 : index
    %c0_42 = arith.constant 0 : index
    %111 = vector.load %arg2[%c3_40, %c0_41, %c0_42] : memref<4x1x128xf32, #tpu.memory_space<vmem>>, vector<1x1x128xf32>
    %112 = vector.shape_cast %111 : vector<1x1x128xf32> to vector<1x128xf32>
    %113 = vector.broadcast %112 : vector<1x128xf32> to vector<8x128xf32>
    %114 = arith.addf %110, %113 : vector<8x128xf32>
    %115 = vector.extract_strided_slice %109 {offsets = [8, 0], sizes = [8, 128], strides = [1, 1]} : vector<24x128xf32> to vector<8x128xf32>
    %116 = vector.extract_strided_slice %109 {offsets = [16, 0], sizes = [8, 128], strides = [1, 1]} : vector<24x128xf32> to vector<8x128xf32>
    %c0_43 = arith.constant 0 : index
    %c0_44 = arith.constant 0 : index
    %117 = vector.load %arg3[%c0_43, %c0_44] : memref<24x128xf32, #tpu.memory_space<vmem>>, vector<8x128xf32>
    tpu.vector_store %arg3[%c0_43, %c0_44], %114 {strides = array<i32>} : memref<24x128xf32, #tpu.memory_space<vmem>>, vector<8x128xf32>,
    %c8 = arith.constant 8 : index
    %c0_45 = arith.constant 0 : index
    %118 = vector.load %arg3[%c8, %c0_45] : memref<24x128xf32, #tpu.memory_space<vmem>>, vector<8x128xf32>
    tpu.vector_store %arg3[%c8, %c0_45], %115 {strides = array<i32>} : memref<24x128xf32, #tpu.memory_space<vmem>>, vector<8x128xf32>,
    %c16 = arith.constant 16 : index
    %c0_46 = arith.constant 0 : index
    %119 = vector.load %arg3[%c16, %c0_46] : memref<24x128xf32, #tpu.memory_space<vmem>>, vector<8x128xf32>
    tpu.vector_store %arg3[%c16, %c0_46], %116 {strides = array<i32>} : memref<24x128xf32, #tpu.memory_space<vmem>>, vector<8x128xf32>,
    return
  }
}

</mosaic_0001>

<bundles_post_ra>
// kernel: net_ag_forward_packed.1
= control target key start
LH: loop header
LB: loop body
LE: loop exit
PB: predicated region body
PF: predicated region fallthrough
CT: control target
= control target key end

     0   :  { %8 = vsyncpa [#allocation3], 0  ;;  %s887_s12 = smov [#allocation2]   ;;  %s1005_s0 = inlined_call_operand.vmem [shape: f32[8,128], index: 0, kind: input, shape index: {}]   ;;  %s1006_s1 = inlined_call_operand.hbm [shape: f32[4,128,128], index: 1, kind: input, shape index: {}]   ;;  %s1007_s2 = inlined_call_operand.vmem [shape: f32[4,1,128], index: 2, kind: input, shape index: {}]   ;;  %s1008_s3 = inlined_call_operand.vmem [shape: f32[24,128], index: 3, kind: output, shape index: {}]  }
   0x1   :  { %s16_s13 = sshll.u32 %s887_s12, 4  ;;  %s863_s16 = scalar_lea.hbm %s1006_s1, 8192  ;;  %s17_s13 = int_to_ptr.vmem [resolvable:$true] %s16_s13 }
   0x2   :  { %p864_p0 = scmp.ne.s32.totalorder %s1006_s1, %s863_s16  ;;  %p867_p1 = scmp.lt.u32.totalorder %s863_s16, %s1006_s1 }
   0x4   :  { %p869_p2 = pnand %p867_p1, %p864_p0 }
   0x6   :  { %872 = shalt.err (!%p869_p2)
}
   0x7   :  { %s873_s21 = scalar_lea.vmem %s17_s13, 8192  ;;  %p878_p4 = scmp.lt.s32.totalorder %s17_s13, %s17_s13 }
   0x8   :  { %p874_p3 = scmp.ne.s32.totalorder %s17_s13, %s873_s21  ;;  %p879_p5 = scmp.lt.s32.totalorder %s873_s21, %s873_s21 }
   0xa   :  { %p880_p6 = por %p879_p5, %p878_p4 }
   0xc   :  { %p881_p7 = pnand %p880_p6, %p874_p3 }
   0xe   :  { %884 = shalt.err (!%p881_p7)
}
   0xf   :  { %s888_s22 = smov 128   ;;  %s889_s23 = smov 8  }
  0x10   :  { %22 = dma.hbm_to_vmem [thread:$0]  %s1006_s1, 8192, %s17_s13, [#allocation3], %s888_s22, %s888_s22, %s889_s23  }
  0x11   :  { %885 = dma.done.wait [#allocation3], 8192  }
  0x12   :  { %886 = vsyncadd [#allocation3], 4294959104  ;;  %v890_v0 = vmov 0.0|0.0   ;;  %vm891_vm0 = vmmov 0   ;;  %v892_v1 = vmov 0.0   ;;  %v931_v2 = vld [vmem:[#allocation2] sm:$0xff] }
  0x13   :  { %749 = vmatprep.subr.bf16.mxu0 %v890_v0  ;;  %623 = vmatprep.mubr.msk.f32.mxu0 %vm891_vm0, %v892_v1  ;;  %v29_v3 = vld [vmem:[#allocation2 + $0x8] sm:$0xff]  ;;  %v30_v4 = vld [vmem:[#allocation2 + $0x10] sm:$0xff]  ;;  %v31_v6 = vld [vmem:[#allocation2 + $0x18] sm:$0xff] }
  0x14   :  { %773 = vmatprep.subr.bf16.mxu1 %v890_v0  ;;  %658 = vmatprep.mubr.msk.f32.mxu1 %vm891_vm0, %v892_v1  ;;  %v750_v5 = vpack.c.bf16 %v29_v3, %v931_v2  ;;  %v753_v7 = vpack.c.bf16 %v31_v6, %v30_v4  ;;  %v32_v8 = vld [vmem:[#allocation2 + $0x20] sm:$0xff]  ;;  %v33_v9 = vld [vmem:[#allocation2 + $0x28] sm:$0xff]  ;;  %v147_v12 = vld [vmem:[#allocation2 + $0x90] sm:$0xff] }
  0x15   :  { %v145_v10 = vld [vmem:[#allocation2 + $0x80] sm:$0xff]  ;;  %v146_v11 = vld [vmem:[#allocation2 + $0x88] sm:$0xff]  ;;  %v148_v13 = vld [vmem:[#allocation2 + $0x98] sm:$0xff]  ;;  %v756_v14 = vpack.c.bf16 %v33_v9, %v32_v8 }
  0x16   :  { %751 = vmatpush3.bf16.msra.mxu0 %v750_v5  ;;  %v774_v15 = vpack.c.bf16 %v146_v11, %v145_v10  ;;  %v34_v16 = vld [vmem:[#allocation2 + $0x30] sm:$0xff]  ;;  %v35_v17 = vld [vmem:[#allocation2 + $0x38] sm:$0xff]  ;;  %v777_v18 = vpack.c.bf16 %v148_v13, %v147_v12  ;;  %v149_v19 = vld [vmem:[#allocation2 + $0xa0] sm:$0xff] }
  0x17   :  { %752 = vmatprep.subr.bf16.mxu0 %v890_v0  ;;  %v150_v20 = vld [vmem:[#allocation2 + $0xa8] sm:$0xff]  ;;  %v759_v21 = vpack.c.bf16 %v35_v17, %v34_v16  ;;  %v36_v22 = vld [vmem:[#allocation2 + $0x40] sm:$0xff]  ;;  %v38_v26 = vld [vmem:[#allocation2 + $0x50] sm:$0xff] }
  0x18   :  { %775 = vmatpush3.bf16.msra.mxu1 %v774_v15  ;;  %v37_v23 = vld [vmem:[#allocation2 + $0x48] sm:$0xff]  ;;  %v780_v24 = vpack.c.bf16 %v150_v20, %v149_v19  ;;  %v39_v27 = vld [vmem:[#allocation2 + $0x58] sm:$0xff]  ;;  %v40_v29 = vld [vmem:[#allocation2 + $0x60] sm:$0xff] }
  0x19   :  { %776 = vmatprep.subr.bf16.mxu1 %v890_v0  ;;  %v762_v25 = vpack.c.bf16 %v37_v23, %v36_v22  ;;  %v765_v28 = vpack.c.bf16 %v39_v27, %v38_v26  ;;  %v41_v30 = vld [vmem:[#allocation2 + $0x68] sm:$0xff]  ;;  %v42_v32 = vld [vmem:[#allocation2 + $0x70] sm:$0xff]  ;;  %v43_v33 = vld [vmem:[#allocation2 + $0x78] sm:$0xff] }
  0x1a   :  { %754 = vmatpush3.bf16.msra.mxu0 %v753_v7  ;;  %v768_v31 = vpack.c.bf16 %v41_v30, %v40_v29  ;;  %v771_v34 = vpack.c.bf16 %v43_v33, %v42_v32  ;;  %v44_v35 = vld [vmem:[%s1005_s0] sm:$0xff]  ;;  %v151_v36 = vld [vmem:[#allocation2 + $0xb0] sm:$0xff]  ;;  %v152_v37 = vld [vmem:[#allocation2 + $0xb8] sm:$0xff]  ;;  %v122_v7 = vlaneseq }
  0x1b   :  { %755 = vmatprep.subr.bf16.mxu0 %v890_v0  ;;  %v783_v38 = vpack.c.bf16 %v152_v37, %v151_v36  ;;  %v153_v39 = vld [vmem:[#allocation2 + $0xc0] sm:$0xff]  ;;  %v154_v40 = vld [vmem:[#allocation2 + $0xc8] sm:$0xff]  ;;  %v155_v42 = vld [vmem:[#allocation2 + $0xd0] sm:$0xff] }
  0x1c   :  { %778 = vmatpush3.bf16.msra.mxu1 %v777_v18  ;;  %v786_v41 = vpack.c.bf16 %v154_v40, %v153_v39  ;;  %v156_v43 = vld [vmem:[#allocation2 + $0xd8] sm:$0xff]  ;;  %v157_v45 = vld [vmem:[#allocation2 + $0xe0] sm:$0xff]  ;;  %v158_v46 = vld [vmem:[#allocation2 + $0xe8] sm:$0xff]  ;;  %v123_v8 = vshrl.u32 %v122_v7, 7 }
  0x1d   :  { %779 = vmatprep.subr.bf16.mxu1 %v890_v0  ;;  %v789_v44 = vpack.c.bf16 %v156_v43, %v155_v42  ;;  %v792_v47 = vpack.c.bf16 %v158_v46, %v157_v45  ;;  %v159_v48 = vld [vmem:[#allocation2 + $0xf0] sm:$0xff]  ;;  %v160_v49 = vld [vmem:[#allocation2 + $0xf8] sm:$0xff]  ;;  %v271_v51 = vld [vmem:[#allocation2 + $0x100] sm:$0xff] }
  0x1e   :  { %757 = vmatpush3.bf16.msra.mxu0 %v756_v14  ;;  %v795_v50 = vpack.c.bf16 %v160_v49, %v159_v48  ;;  %v272_v52 = vld [vmem:[#allocation2 + $0x108] sm:$0xff]  ;;  %v273_v53 = vld [vmem:[#allocation2 + $0x110] sm:$0xff]  ;;  %v274_v55 = vld [vmem:[#allocation2 + $0x118] sm:$0xff]  ;;  %v124_v10 = vsub.s32 0, %v123_v8 }
  0x1f   :  { %758 = vmatprep.subr.bf16.mxu0 %v890_v0  ;;  %v798_v54 = vpack.c.bf16 %v272_v52, %v271_v51  ;;  %v801_v56 = vpack.c.bf16 %v274_v55, %v273_v53  ;;  %v275_v57 = vld [vmem:[#allocation2 + $0x120] sm:$0xff]  ;;  %v276_v58 = vld [vmem:[#allocation2 + $0x128] sm:$0xff]  ;;  %v281_v30 = vld [vmem:[#allocation2 + $0x150] sm:$0xff] }
  0x20   :  { %781 = vmatpush3.bf16.msra.mxu1 %v780_v24  ;;  %v804_v59 = vpack.c.bf16 %v276_v58, %v275_v57  ;;  %v510_v60 = vld [vmem:[%s1007_s2] ss:$0 sm:$0xff]  ;;  %v125_v14 = vrot.slane %v931_v2, %v124_v10  ;;  %v277_v2 = vld [vmem:[#allocation2 + $0x130] sm:$0xff]  ;;  %v286_v37 = vld [vmem:[#allocation2 + $0x178] sm:$0xff] }
  0x21   :  { %782 = vmatprep.subr.bf16.mxu1 %v890_v0  ;;  %v279_v27 = vld [vmem:[#allocation2 + $0x140] sm:$0xff]  ;;  %v285_v36 = vld [vmem:[#allocation2 + $0x170] sm:$0xff]  ;;  %v398_v40 = vld [vmem:[#allocation2 + $0x188] sm:$0xff] }
  0x22   :  { %760 = vmatpush3.bf16.msra.mxu0 %v759_v21  ;;  %v142_v18 = vmul.f32 %v125_v14, %v125_v14  ;;  %v283_v33 = vld [vmem:[#allocation2 + $0x160] sm:$0xff]  ;;  %v400_v43 = vld [vmem:[#allocation2 + $0x198] sm:$0xff]  ;;  %v402_v46 = vld [vmem:[#allocation2 + $0x1a8] sm:$0xff] }
  0x23   :  { %761 = vmatprep.subr.bf16.mxu0 %v890_v0  ;;  %v397_v39 = vld [vmem:[#allocation2 + $0x180] sm:$0xff] }
  0x24   :  { %784 = vmatpush3.bf16.msra.mxu1 %v783_v38  ;;  %v819_v38 = vpack.c.bf16 %v286_v37, %v285_v36  ;;  %v822_v42 = vpack.c.bf16 %v398_v40, %v397_v39  ;;  %v401_v45 = vld [vmem:[#allocation2 + $0x1a0] sm:$0xff] }
  0x25   :  { %785 = vmatprep.subr.bf16.mxu1 %v890_v0  ;;  %v512_v48 = vld [vmem:[%s1007_s2 + $0x1] ss:$0 sm:$0xff] }
  0x26   :  { %763 = vmatpush3.bf16.msra.mxu0 %v762_v25  ;;  %v278_v25 = vld [vmem:[#allocation2 + $0x138] sm:$0xff] }
  0x27   :  { %764 = vmatprep.subr.bf16.mxu0 %v890_v0  ;;  %v807_v26 = vpack.c.bf16 %v278_v25, %v277_v2  ;;  %v410_v2 = vld [vmem:[#allocation2 + $0x1e8] sm:$0xff] }
  0x28   :  { %787 = vmatpush3.bf16.msra.mxu1 %v786_v41  ;;  %v399_v41 = vld [vmem:[#allocation2 + $0x190] sm:$0xff] }
  0x29   :  { %788 = vmatprep.subr.bf16.mxu1 %v890_v0 }
  0x2a   :  { %766 = vmatpush3.bf16.msra.mxu0 %v765_v28  ;;  %v280_v28 = vld [vmem:[#allocation2 + $0x148] sm:$0xff] }
  0x2b   :  { %767 = vmatprep.subr.bf16.mxu0 %v890_v0  ;;  %v810_v29 = vpack.c.bf16 %v280_v28, %v279_v27  ;;  %v412_v27 = vld [vmem:[#allocation2 + $0x1f8] sm:$0xff] }
  0x2c   :  { %790 = vmatpush3.bf16.msra.mxu1 %v789_v44  ;;  %v825_v44 = vpack.c.bf16 %v400_v43, %v399_v41 }
  0x2d   :  { %791 = vmatprep.subr.bf16.mxu1 %v890_v0 }
  0x2e   :  { %769 = vmatpush3.bf16.msra.mxu0 %v768_v31  ;;  %v282_v31 = vld [vmem:[#allocation2 + $0x158] sm:$0xff] }
  0x2f   :  { %770 = vmatprep.subr.bf16.mxu0 %v890_v0  ;;  %v813_v32 = vpack.c.bf16 %v282_v31, %v281_v30 }
  0x30   :  { %793 = vmatpush3.bf16.msra.mxu1 %v792_v47  ;;  %v828_v47 = vpack.c.bf16 %v402_v46, %v401_v45 }
  0x31   :  { %794 = vmatprep.subr.bf16.mxu1 %v890_v0 }
  0x32   :  { %772 = vmatpush3.bf16.msra.mxu0 %v771_v34  ;;  %v284_v34 = vld [vmem:[#allocation2 + $0x168] sm:$0xff] }
  0x33   :  { %797 = vmatprep.subr.bf16.mxu0 %v890_v0 }
  0x34   :  { %796 = vmatpush3.bf16.msra.mxu1 %v795_v50 }
  0x35   :  { %624 = vmatmul.mubr.f32.vlgmr.msra.gmra.mrb[0].mxu0 %v44_v35  ;;  %821 = vmatprep.subr.bf16.mxu1 %v890_v0  ;;  %v816_v35 = vpack.c.bf16 %v284_v34, %v283_v33 }
  0x36   :  { %699 = vmatprep.mubr.msk.f32.mxu0 %vm891_vm0, %v892_v1  ;;  %799 = vmatpush3.bf16.msra.mxu0 %v798_v54 }
  0x37   :  { %800 = vmatprep.subr.bf16.mxu0 %v890_v0 }
  0x3a   :  { %802 = vmatpush3.bf16.msra.mxu0 %v801_v56 }
  0x3b   :  { %803 = vmatprep.subr.bf16.mxu0 %v890_v0 }
  0x3e   :  { %805 = vmatpush3.bf16.msra.mxu0 %v804_v59 }
  0x3f   :  { %806 = vmatprep.subr.bf16.mxu0 %v890_v0 }
  0x42   :  { %808 = vmatpush3.bf16.msra.mxu0 %v807_v26  ;;  %v411_v26 = vld [vmem:[#allocation2 + $0x1f0] sm:$0xff] }
  0x43   :  { %809 = vmatprep.subr.bf16.mxu0 %v890_v0  ;;  %v843_v28 = vpack.c.bf16 %v412_v27, %v411_v26 }
  0x46   :  { %811 = vmatpush3.bf16.msra.mxu0 %v810_v29  ;;  %v514_v29 = vld [vmem:[%s1007_s2 + $0x2] ss:$0 sm:$0xff] }
  0x47   :  { %812 = vmatprep.subr.bf16.mxu0 %v890_v0 }
  0x4a   :  { %814 = vmatpush3.bf16.msra.mxu0 %v813_v32 }
  0x4b   :  { %815 = vmatprep.subr.bf16.mxu0 %v890_v0 }
  0x4e   :  { %817 = vmatpush3.bf16.msra.mxu0 %v816_v35 }
  0x4f   :  { %818 = vmatprep.subr.bf16.mxu0 %v890_v0 }
  0x52   :  { %820 = vmatpush3.bf16.msra.mxu0 %v819_v38 }
 0x108   :  { %v118_v61 = vpop.f32.mrb[0].mxu0 }
 0x109   :  { %v119_v62 = vadd.f32 %v510_v60, %v118_v61  ;;  %v625_v63 = vpop.f32.mrb[1].mxu0 }
 0x10b   :  { %v131_v3 = vmul.f32 0.70710677, %v119_v62  ;;  %v126_v4 = vmul.f32 -0.5, %v119_v62 }
 0x10d   :  { %851 = verf.f32 %v131_v3  ;;  %v127_v5 = vmul.f32 %v126_v4, %v119_v62 }
 0x10f   :  { %v128_v6 = vmul.f32 1.442695, %v127_v5 }
 0x111   :  { %853 = vpow2.f32 %v128_v6 }
 0x117   :  { %v852_v9 = vpop.eup %851 }
 0x118   :  { %v133_v11 = vadd.f32 1.0, %v852_v9 }
 0x11a   :  { %v134_v12 = vmul.f32 0.5, %v133_v11 }
 0x11b   :  { %v854_v13 = vpop.eup %853 }
 0x11c   :  { %v140_v15 = vmul.f32 %v134_v12, %v119_v62  ;;  %v130_v16 = vmul.f32 0.3989423, %v854_v13 }
 0x11e   :  { %659 = vmatmul.mubr.f32.vlgmr.msra.gmra.mrb[0].mxu1 %v140_v15  ;;  %v135_v17 = vmul.f32 %v130_v16, %v119_v62  ;;  %v137_v20 = vmul.f32 2.0, %v130_v16  ;;  %v403_v15 = vld [vmem:[#allocation2 + $0x1b0] sm:$0xff]  ;;  %v404_v16 = vld [vmem:[#allocation2 + $0x1b8] sm:$0xff] }
 0x11f   :  { %661 = vmatprep.mubr.msk.f32.mxu1 %vm891_vm0, %v892_v1  ;;  %823 = vmatpush3.bf16.msra.mxu1 %v822_v42 }
 0x120   :  { %v136_v19 = vadd.f32 %v135_v17, %v134_v12  ;;  %v138_v21 = vmul.f32 %v135_v17, %v119_v62  ;;  %824 = vmatprep.subr.bf16.mxu1 %v890_v0  ;;  %v831_v17 = vpack.c.bf16 %v404_v16, %v403_v15 }
 0x122   :  { %v141_v22 = vmul.f32 %v136_v19, %v125_v14  ;;  %v139_v23 = vsub.f32 %v137_v20, %v138_v21  ;;  %v406_v19 = vld [vmem:[#allocation2 + $0x1c8] sm:$0xff]  ;;  %v407_v21 = vld [vmem:[#allocation2 + $0x1d0] sm:$0xff] }
 0x123   :  { %826 = vmatpush3.bf16.msra.mxu1 %v825_v44 }
 0x124   :  { %662 = vmatmul.mubr.f32.gmra.mrb[2].mxu1 %v141_v22  ;;  %v143_v24 = vmul.f32 %v142_v18, %v139_v23  ;;  %827 = vmatprep.subr.bf16.mxu1 %v890_v0  ;;  %v405_v18 = vld [vmem:[#allocation2 + $0x1c0] sm:$0xff]  ;;  %v408_v22 = vld [vmem:[#allocation2 + $0x1d8] sm:$0xff] }
 0x125   :  { %664 = vmatprep.mubr.msk.f32.mxu1 %vm891_vm0, %v892_v1  ;;  %v834_v20 = vpack.c.bf16 %v406_v19, %v405_v18  ;;  %v837_v23 = vpack.c.bf16 %v408_v22, %v407_v21 }
 0x127   :  { %829 = vmatpush3.bf16.msra.mxu1 %v828_v47 }
 0x128   :  { %665 = vmatmul.mubr.f32.gmra.mrb[4].mxu1 %v143_v24  ;;  %830 = vmatprep.subr.bf16.mxu1 %v890_v0  ;;  %v409_v24 = vld [vmem:[#allocation2 + $0x1e0] sm:$0xff] }
 0x129   :  { %740 = vmatprep.mubr.msk.f32.mxu1 %vm891_vm0, %v892_v1  ;;  %v840_v25 = vpack.c.bf16 %v410_v2, %v409_v24 }
 0x12b   :  { %832 = vmatpush3.bf16.msra.mxu1 %v831_v17 }
 0x12c   :  { %833 = vmatprep.subr.bf16.mxu1 %v890_v0 }
 0x12f   :  { %835 = vmatpush3.bf16.msra.mxu1 %v834_v20 }
 0x130   :  { %836 = vmatprep.subr.bf16.mxu1 %v890_v0 }
 0x133   :  { %838 = vmatpush3.bf16.msra.mxu1 %v837_v23 }
 0x134   :  { %839 = vmatprep.subr.bf16.mxu1 %v890_v0 }
 0x137   :  { %841 = vmatpush3.bf16.msra.mxu1 %v840_v25 }
 0x138   :  { %842 = vmatprep.subr.bf16.mxu1 %v890_v0 }
 0x13b   :  { %844 = vmatpush3.bf16.msra.mxu1 %v843_v28 }
 0x1f1   :  { %v227_v49 = vpop.f32.mrb[0].mxu1 }
 0x1f2   :  { %v249_v50 = vadd.f32 %v512_v48, %v227_v49  ;;  %v660_v51 = vpop.f32.mrb[1].mxu1 }
 0x1f4   :  { %v250_v52 = vmul.f32 -0.5, %v249_v50  ;;  %v255_v53 = vmul.f32 0.70710677, %v249_v50 }
 0x1f6   :  { %v251_v54 = vmul.f32 %v250_v52, %v249_v50  ;;  %855 = verf.f32 %v255_v53 }
 0x1f7   :  { %v232_v55 = vpop.f32.mrb[2].mxu1 }
 0x1f8   :  { %v252_v56 = vmul.f32 1.442695, %v251_v54  ;;  %v663_v57 = vpop.f32.mrb[3].mxu1  ;;  %v266_v11 = vmul.f32 %v232_v55, %v232_v55 }
 0x1fa   :  { %857 = vpow2.f32 %v252_v56  ;;  %v516_v56 = vld [vmem:[%s1007_s2 + $0x3] ss:$0 sm:$0xff] }
 0x1fb   :  { %v237_v58 = vpop.f32.mrb[4].mxu1 }
 0x1fc   :  { %v666_v59 = vpop.f32.mrb[5].mxu1 }
 0x200   :  { %v856_v60 = vpop.eup %855 }
 0x201   :  { %v257_v61 = vadd.f32 1.0, %v856_v60 }
 0x203   :  { %v258_v62 = vmul.f32 0.5, %v257_v61 }
 0x204   :  { %v858_v63 = vpop.eup %857 }
 0x205   :  { %v254_v3 = vmul.f32 0.3989423, %v858_v63  ;;  %v264_v4 = vmul.f32 %v258_v62, %v249_v50 }
 0x207   :  { %v259_v5 = vmul.f32 %v254_v3, %v249_v50  ;;  %700 = vmatmul.mubr.f32.vlgmr.msra.gmra.mrb[2].mxu0 %v264_v4  ;;  %v261_v7 = vmul.f32 2.0, %v254_v3 }
 0x208   :  { %702 = vmatprep.mubr.msk.f32.mxu0 %vm891_vm0, %v892_v1 }
 0x209   :  { %v260_v6 = vadd.f32 %v259_v5, %v258_v62  ;;  %v262_v8 = vmul.f32 %v259_v5, %v249_v50 }
 0x20b   :  { %v263_v9 = vsub.f32 %v261_v7, %v262_v8  ;;  %v265_v10 = vmul.f32 %v260_v6, %v232_v55  ;;  %v268_v12 = vmul.f32 %v260_v6, %v237_v58 }
 0x20d   :  { %v267_v13 = vmul.f32 %v266_v11, %v263_v9  ;;  %703 = vmatmul.mubr.f32.gmra.mrb[4].mxu0 %v265_v10 }
 0x20e   :  { %705 = vmatprep.mubr.msk.f32.mxu0 %vm891_vm0, %v892_v1 }
 0x20f   :  { %v269_v14 = vadd.f32 %v268_v12, %v267_v13 }
 0x211   :  { %706 = vmatmul.mubr.f32.gmra.mrb[6].mxu0 %v269_v14 }
 0x2da   :  { %v353_v30 = vpop.f32.mrb[2].mxu0 }
 0x2db   :  { %v375_v31 = vadd.f32 %v514_v29, %v353_v30  ;;  %v701_v32 = vpop.f32.mrb[3].mxu0 }
 0x2dd   :  { %v376_v33 = vmul.f32 -0.5, %v375_v31  ;;  %v381_v34 = vmul.f32 0.70710677, %v375_v31 }
 0x2df   :  { %v377_v35 = vmul.f32 %v376_v33, %v375_v31  ;;  %859 = verf.f32 %v381_v34 }
 0x2e0   :  { %v358_v36 = vpop.f32.mrb[4].mxu0 }
 0x2e1   :  { %v378_v37 = vmul.f32 1.442695, %v377_v35  ;;  %v704_v38 = vpop.f32.mrb[5].mxu0  ;;  %v392_v52 = vmul.f32 %v358_v36, %v358_v36 }
 0x2e3   :  { %861 = vpow2.f32 %v378_v37 }
 0x2e4   :  { %v363_v0 = vpop.f32.mrb[6].mxu0 }
 0x2e5   :  { %v707_v39 = vpop.f32.mrb[7].mxu0 }
 0x2e9   :  { %v860_v40 = vpop.eup %859 }
 0x2ea   :  { %v383_v41 = vadd.f32 1.0, %v860_v40 }
 0x2ec   :  { %v384_v42 = vmul.f32 0.5, %v383_v41 }
 0x2ed   :  { %v862_v43 = vpop.eup %861 }
 0x2ee   :  { %v380_v44 = vmul.f32 0.3989423, %v862_v43  ;;  %v390_v45 = vmul.f32 %v384_v42, %v375_v31 }
 0x2f0   :  { %v385_v46 = vmul.f32 %v380_v44, %v375_v31  ;;  %741 = vmatmul.mubr.f32.vlgmr.msra.gmra.mrb[6].mxu1 %v390_v45  ;;  %v387_v48 = vmul.f32 2.0, %v380_v44 }
 0x2f1   :  { %743 = vmatprep.mubr.msk.f32.mxu1 %vm891_vm0, %v892_v1 }
 0x2f2   :  { %v386_v47 = vadd.f32 %v385_v46, %v384_v42  ;;  %v388_v49 = vmul.f32 %v385_v46, %v375_v31 }
 0x2f4   :  { %v389_v50 = vsub.f32 %v387_v48, %v388_v49  ;;  %v391_v51 = vmul.f32 %v386_v47, %v358_v36  ;;  %v394_v53 = vmul.f32 %v386_v47, %v363_v0 }
 0x2f6   :  { %v393_v54 = vmul.f32 %v392_v52, %v389_v50  ;;  %744 = vmatmul.mubr.f32.gmra.mrb[8].mxu1 %v391_v51 }
 0x2f7   :  { %746 = vmatprep.mubr.msk.f32.mxu1 %vm891_vm0, %v892_v1 }
 0x2f8   :  { %v395_v55 = vadd.f32 %v394_v53, %v393_v54 }
 0x2fa   :  { %747 = vmatmul.mubr.f32.gmra.mrb[10].mxu1 %v395_v55 }
 0x3c3   :  { %v479_v57 = vpop.f32.mrb[6].mxu1 }
 0x3c4   :  { %v501_v58 = vadd.f32 %v516_v56, %v479_v57  ;;  %v742_v59 = vpop.f32.mrb[7].mxu1 }
 0x3c6   :  { %502 = vst [vmem:[%s1008_s3] sm:$0xff] %v501_v58 }
 0x3c9   :  { %v484_v60 = vpop.f32.mrb[8].mxu1 }
 0x3ca   :  { %503 = vst [vmem:[%s1008_s3 + $0x8] sm:$0xff] %v484_v60  ;;  %v745_v61 = vpop.f32.mrb[9].mxu1 }
 0x3cd   :  { %v489_v1 = vpop.f32.mrb[10].mxu1 }
 0x3ce   :  { %504 = vst [vmem:[%s1008_s3 + $0x10] sm:$0xff] %v489_v1  ;;  %v748_v62 = vpop.f32.mrb[11].mxu1 }
 0x3cf   :  { %509 = vsyncpa [#allocation3], 1 }

</bundles_post_ra>
